<compile_context>
chip_gen: v5e
topology: v5e:2x2
jax: 0.10.0
libtpu: 0.0.40
codegen_flags: <defaults>
</compile_context>

<pallas_src>
import jax
import jax.numpy as jnp
from jax.experimental import pallas as pl
from jax.experimental.pallas import tpu as pltpu

_LANE = 128
_MAX_COLS = 32768                        # target lane-dense block width
_TARGET_BLOCK_BYTES = 4 * 1024 * 1024    # ~4 MiB blocks -> <=16 MiB live VMEM
_MAX_SINGLE_BLOCK_BYTES = 4 * 1024 * 1024
_VMEM_LIMIT_BYTES = 32 * 1024 * 1024     # safe on v5e/v6e (128 MiB) and v7x (64 MiB)


def _identity_kernel(x_ref, o_ref):
    # The entire "compute": copy the VMEM tile through.
    o_ref[...] = x_ref[...]


def _sublane_multiple(dtype) -> int:
    """Sublane packing multiple for the dtype (8 f32 / 16 bf16 / 32 int8-fp8)."""
    itemsize = jnp.dtype(dtype).itemsize
    if itemsize >= 4:
        return 8
    if itemsize == 2:
        return 16
    return 32


def _pick_cols(total: int, sub: int):
    """Largest multiple-of-128 divisor of `total` (capped at _MAX_COLS),
    preferring one that leaves at least `sub` rows so sublanes are used."""
    if total < _LANE:
        return None
    start = (min(_MAX_COLS, total) // _LANE) * _LANE
    best = None
    for c in range(start, _LANE - 1, -_LANE):
        if total % c == 0:
            if best is None:
                best = c
            if total // c >= sub:
                return c
    return best


def _pick_row_tile(rows: int, cols: int, itemsize: int, sub: int):
    """Row tile: a multiple of the dtype sublane packing that divides `rows`,
    sized so one block is ~_TARGET_BLOCK_BYTES. Returns None if no legal tiling."""
    max_tr = max(1, _TARGET_BLOCK_BYTES // (cols * itemsize))
    for step in (sub, 8):  # prefer packed-dtype multiple, fall back to min legal 8
        if rows % step != 0:
            continue
        t = (min(rows, max_tr) // step) * step
        t = max(t, step)
        while t >= step:
            if rows % t == 0:
                return t
            t -= step
    # rows not a multiple of 8: only a full-extent block is legal.
    if rows * cols * itemsize <= _MAX_SINGLE_BLOCK_BYTES:
        return rows
    return None


def identity_pallas(x: jax.Array) -> jax.Array:
    """Identity forward pass via a lane-dense, tiled Pallas copy kernel."""
    orig_shape = x.shape
    total = int(x.size)
    if total == 0:
        return x

    itemsize = jnp.dtype(x.dtype).itemsize
    sub = _sublane_multiple(x.dtype)

    cols = _pick_cols(total, sub)
    if cols is None:
        # No lane-dense tiling possible; identity requires no data movement.
        return x

    rows = total // cols
    tr = _pick_row_tile(rows, cols, itemsize, sub)
    if tr is None:
        # A clean tiling would need masking or an oversized block; bypass.
        return x

    x2 = x.reshape(rows, cols)
    out = pl.pallas_call(
        _identity_kernel,
        out_shape=jax.ShapeDtypeStruct((rows, cols), x.dtype),
        grid_spec=pltpu.PrefetchScalarGridSpec(
            num_scalar_prefetch=0,
            grid=(rows // tr,),
            in_specs=[pl.BlockSpec((tr, cols), lambda i: (i, 0))],
            out_specs=pl.BlockSpec((tr, cols), lambda i: (i, 0)),
        ),
        input_output_aliases={0: 0},
        compiler_params=pltpu.CompilerParams(
            dimension_semantics=("parallel",),
            vmem_limit_bytes=_VMEM_LIMIT_BYTES,
        ),
    )(x2)
    return out.reshape(orig_shape)


if __name__ == "__main__":
    key = jax.random.PRNGKey(0)
    # NCHW input, small shapes: batch=2, channels=4, spatial=16x16.
    x = jax.random.normal(key, (2, 4, 16, 16), dtype=jnp.float32)

    y = identity_pallas(x)
    y = jax.block_until_ready(y)

    assert y.shape == x.shape, (y.shape, x.shape)
    assert y.dtype == x.dtype, (y.dtype, x.dtype)
    assert bool(jnp.all(y == x)), "identity output mismatch"

    print("KERNEL_OK")
</pallas_src>

<mosaic_0001>
module attributes {stable_mosaic.version = 11 : i64} {
  func.func @_identity_kernel(%arg0: i32, %arg1: memref<8x256xf32, #tpu.memory_space<vmem>>, %arg2: memref<8x256xf32, #tpu.memory_space<vmem>>) attributes {dimension_semantics = [#tpu.dimension_semantics<parallel>], iteration_bounds = array<i64: 1>, scalar_prefetch = 0 : i64, scratch_operands = 0 : i64, tpu.core_type = #tpu.core_type<tc>, window_params = [{transform_indices = @transform_0, window_bounds = array<i64: 8, 256>}, {transform_indices = @transform_1, window_bounds = array<i64: 8, 256>}]} {
    %c0 = arith.constant 0 : index
    %c0_0 = arith.constant 0 : index
    %0 = vector.load %arg1[%c0, %c0_0] : memref<8x256xf32, #tpu.memory_space<vmem>>, vector<8x256xf32>
    %c0_1 = arith.constant 0 : index
    %c0_2 = arith.constant 0 : index
    %1 = vector.load %arg2[%c0_1, %c0_2] : memref<8x256xf32, #tpu.memory_space<vmem>>, vector<8x256xf32>
    tpu.vector_store %arg2[%c0_1, %c0_2], %0 {strides = array<i32>} : memref<8x256xf32, #tpu.memory_space<vmem>>, vector<8x256xf32>,
    return
  }
  func.func @transform_0(%arg0: i32) -> (i32, i32) {
    %c0_i32 = arith.constant 0 : i32
    %c0_i32_0 = arith.constant 0 : i32
    return %arg0, %c0_i32 : i32, i32
  }
  func.func @transform_1(%arg0: i32) -> (i32, i32) {
    %c0_i32 = arith.constant 0 : i32
    %c0_i32_0 = arith.constant 0 : i32
    return %arg0, %c0_i32 : i32, i32
  }
}

</mosaic_0001>

<bundles_post_ra>
// kernel: tpu_custom_call.1
= control target key start
LH: loop header
LB: loop body
LE: loop exit
PB: predicated region body
PF: predicated region fallthrough
CT: control target
= control target key end

     0   :  { %6 = vsyncpa [#allocation3], 0  ;;  %s116_s0 = inlined_call_operand.hbm [shape: f32[8,256], index: 0, kind: input, shape index: {}, may-alias: {0,1}]   ;;  %s117_s1 = inlined_call_operand.hbm [shape: f32[8,256], index: 1, kind: output, shape index: {}, may-alias: {0,1}]  }
   0x1   :  { %7 = vsyncpa [#allocation4], 0  ;;  %s13_s8 = sshll.u32 %s116_s0, 4  ;;  %s98_s9 = smov [#allocation2]   ;;  %s14_s8 = int_to_ptr.hbm [resolvable:$true] %s13_s8 }
   0x2   :  { %s15_s10 = sshll.u32 %s98_s9, 4  ;;  %s16_s10 = int_to_ptr.vmem [resolvable:$true] %s15_s10 }
   0x3   :  { %18 = dma.hbm_to_vmem [thread:$0]  %s14_s8, 256, %s16_s10, [#allocation3]  }
   0x4   :  { %94 = dma.done.wait [#allocation3], 256  }
   0x5   :  { %95 = vsyncadd [#allocation3], 4294967040  ;;  %s99_s11 = smov [#allocation5]   ;;  %s34_s15 = sshll.u32 %s117_s1, 4  ;;  %v23_v0 = vld [vmem:[#allocation2] sm:$0xff]  ;;  %v24_v1 = vld [vmem:[#allocation2 + $0x8] sm:$0xff]  ;;  %s35_s15 = int_to_ptr.hbm [resolvable:$true] %s34_s15 }
   0x6   :  { %s32_s12 = sshll.u32 %s99_s11, 4  ;;  %25 = vst [vmem:[#allocation5] sm:$0xff] %v23_v0  ;;  %s33_s12 = int_to_ptr.vmem [resolvable:$true] %s32_s12 }
   0x7   :  { %26 = vst [vmem:[#allocation5 + $0x8] sm:$0xff] %v24_v1 }
   0x8   :  { %37 = dma.vmem_to_hbm [thread:$0]  %s33_s12, 256, %s35_s15, [#allocation4]  }
   0x9   :  { %96 = dma.done.wait [#allocation4], 256  }
   0xa   :  { %97 = vsyncadd [#allocation4], 4294967040 }
   0xb   :  { %42 = vsyncpa [#allocation3], 1 }
   0xc   :  { %43 = vsyncpa [#allocation4], 1 }

</bundles_post_ra>
